<compile_context>
chip_gen: v6e
topology: v6e:2x2x1
jax: 0.10.0
libtpu: 0.0.40
codegen_flags: <defaults>
</compile_context>

<pallas_src>
import jax
import jax.numpy as jnp
from jax.experimental import pallas as pl
from jax.experimental.pallas import tpu as pltpu

PAD = 128           # lane width every layer dim is padded to
NUM_LAYERS = 6      # fixed by the module: 6 nn.Linear layers
MAX_TILE_B = 1024   # batch-tile cap (rows); keeps double-buffered tiles tiny in VMEM


def _round_up(x, m):
    return ((x + m - 1) // m) * m


def _mlp_kernel(x_ref, w_ref, b_ref, o_ref):
    # x_ref : (TILE_B, 128)   padded activations for this batch tile
    # w_ref : (6, 128, 128)   zero-padded (in, out) weights, grid-invariant (VMEM-resident)
    # b_ref : (6, 1, 128)     zero-padded biases, grid-invariant (VMEM-resident)
    # o_ref : (TILE_B, 128)   padded logits (real classes live in lanes [:num_classes])
    h = x_ref[...]
    h = jnp.maximum(jnp.dot(h, w_ref[0], preferred_element_type=jnp.float32) + b_ref[0], 0.0)
    h = jnp.maximum(jnp.dot(h, w_ref[1], preferred_element_type=jnp.float32) + b_ref[1], 0.0)
    h = jnp.maximum(jnp.dot(h, w_ref[2], preferred_element_type=jnp.float32) + b_ref[2], 0.0)
    h = jnp.maximum(jnp.dot(h, w_ref[3], preferred_element_type=jnp.float32) + b_ref[3], 0.0)
    h = jnp.maximum(jnp.dot(h, w_ref[4], preferred_element_type=jnp.float32) + b_ref[4], 0.0)
    o_ref[...] = jnp.dot(h, w_ref[5], preferred_element_type=jnp.float32) + b_ref[5]


def make_params(input_size: int, num_classes: int, key):
    """Synthetic nn.Linear-like parameters.  Weights stored as (in, out) so the kernel
    computes x @ W + b (== PyTorch's x @ W.T + b with W stored (out, in))."""
    dims = [input_size, 75, 50, 30, 14, 12, num_classes]
    params = []
    for i in range(NUM_LAYERS):
        key, kw, kb = jax.random.split(key, 3)
        fan_in = dims[i]
        bound = 1.0 / jnp.sqrt(fan_in)
        w = jax.random.uniform(kw, (dims[i], dims[i + 1]),
                               minval=-bound, maxval=bound, dtype=jnp.float32)
        b = jax.random.uniform(kb, (dims[i + 1],),
                               minval=-bound, maxval=bound, dtype=jnp.float32)
        params.append((w, b))
    return params


def _pack_params(params):
    """Zero-pad each (in,out) weight to (128,128) and each bias to (1,128); stack into one
    weight slab and one bias slab so the kernel sees exactly 3 operands."""
    w_slab = jnp.zeros((NUM_LAYERS, PAD, PAD), jnp.float32)
    b_slab = jnp.zeros((NUM_LAYERS, 1, PAD), jnp.float32)
    for i, (w, b) in enumerate(params):
        fin, fout = w.shape
        assert fin <= PAD and fout <= PAD, "layer dims must fit in one 128-lane tile"
        w_slab = w_slab.at[i, :fin, :fout].set(w.astype(jnp.float32))
        b_slab = b_slab.at[i, 0, :fout].set(b.astype(jnp.float32).reshape(-1))
    return w_slab, b_slab


def neural_net_forward(x, params, *, tile_b=None):
    batch, in_features = x.shape
    num_classes = params[-1][0].shape[1]
    assert in_features <= PAD, "input_size must fit in one 128-lane tile"

    w_slab, b_slab = _pack_params(params)

    # Batch tile: multiple of 128 (MXU M granularity), capped so double-buffered activation
    # and output tiles stay a couple of MiB even under v7x's 64 MiB VMEM.
    if tile_b is None:
        tile_b = min(MAX_TILE_B, _round_up(max(batch, 1), 128))
    padded_batch = _round_up(batch, tile_b)

    # Zero-pad batch rows and feature lanes up to the tile/lane grid.
    x_p = jnp.pad(x.astype(jnp.float32),
                  ((0, padded_batch - batch), (0, PAD - in_features)))

    grid = (padded_batch // tile_b,)
    out_padded = pl.pallas_call(
        _mlp_kernel,
        out_shape=jax.ShapeDtypeStruct((padded_batch, PAD), jnp.float32),
        grid=grid,
        in_specs=[
            pl.BlockSpec((tile_b, PAD), lambda i: (i, 0)),              # activations: batch-tiled
            pl.BlockSpec((NUM_LAYERS, PAD, PAD), lambda i: (0, 0, 0)),  # weights: grid-invariant
            pl.BlockSpec((NUM_LAYERS, 1, PAD), lambda i: (0, 0, 0)),    # biases:  grid-invariant
        ],
        out_specs=pl.BlockSpec((tile_b, PAD), lambda i: (i, 0)),
        compiler_params=pltpu.CompilerParams(
            dimension_semantics=("parallel",),   # megacore sharding of the batch grid on v7x
            vmem_limit_bytes=64 << 20,
        ),
    )(x_p, w_slab, b_slab)

    # Slice padded logits back to the real problem size.
    return out_padded[:batch, :num_classes]


def reference_forward(x, params):
    h = x
    for i, (w, b) in enumerate(params):
        h = h @ w + b
        if i < len(params) - 1:
            h = jnp.maximum(h, 0.0)
    return h


if __name__ == "__main__":
    input_size = 32
    num_classes = 10
    batch = 8

    key = jax.random.PRNGKey(0)
    key, kx = jax.random.split(key)
    x = jax.random.normal(kx, (batch, input_size), dtype=jnp.float32)

    params = make_params(input_size, num_classes, key)

    out = neural_net_forward(x, params)
    out = jax.block_until_ready(out)

    ref = reference_forward(x, params)
    assert out.shape == (batch, num_classes)
    assert jnp.allclose(out, ref, atol=1e-5, rtol=1e-5)

    print("KERNEL_OK")
</pallas_src>

<mosaic_0001>
module attributes {stable_mosaic.version = 11 : i64} {
  func.func @_mlp_kernel(%arg0: i32, %arg1: memref<128x128xf32, #tpu.memory_space<vmem>>, %arg2: memref<6x128x128xf32, #tpu.memory_space<vmem>>, %arg3: memref<6x1x128xf32, #tpu.memory_space<vmem>>, %arg4: memref<128x128xf32, #tpu.memory_space<vmem>>) attributes {dimension_semantics = [#tpu.dimension_semantics<parallel>], iteration_bounds = array<i64: 1>, scalar_prefetch = 0 : i64, scratch_operands = 0 : i64, tpu.core_type = #tpu.core_type<tc>, window_params = [{transform_indices = @transform_0, window_bounds = array<i64: 128, 128>}, {pipeline_mode = #tpu.pipeline_mode<synchronous>, transform_indices = @transform_1, window_bounds = array<i64: 6, 128, 128>}, {pipeline_mode = #tpu.pipeline_mode<synchronous>, transform_indices = @transform_2, window_bounds = array<i64: 6, 1, 128>}, {transform_indices = @transform_3, window_bounds = array<i64: 128, 128>}]} {
    %c0 = arith.constant 0 : index
    %c0_0 = arith.constant 0 : index
    %0 = vector.load %arg1[%c0, %c0_0] : memref<128x128xf32, #tpu.memory_space<vmem>>, vector<128x128xf32>
    %c0_1 = arith.constant 0 : index
    %c0_2 = arith.constant 0 : index
    %c0_3 = arith.constant 0 : index
    %1 = vector.load %arg2[%c0_1, %c0_2, %c0_3] : memref<6x128x128xf32, #tpu.memory_space<vmem>>, vector<1x128x128xf32>
    %2 = vector.shape_cast %1 : vector<1x128x128xf32> to vector<128x128xf32>
    %cst = arith.constant dense<0.000000e+00> : vector<128x128xf32>
    %3 = tpu.matmul %0, %2, %cst {dimension_numbers = #tpu.dot_dimension_numbers<[1], [0], [0], [1], [0, 0, 1, 1], [], []>} : vector<128x128xf32>, vector<128x128xf32>, vector<128x128xf32> -> vector<128x128xf32>
    %c0_4 = arith.constant 0 : index
    %c0_5 = arith.constant 0 : index
    %c0_6 = arith.constant 0 : index
    %4 = vector.load %arg3[%c0_4, %c0_5, %c0_6] : memref<6x1x128xf32, #tpu.memory_space<vmem>>, vector<1x1x128xf32>
    %5 = vector.shape_cast %4 : vector<1x1x128xf32> to vector<1x128xf32>
    %6 = vector.broadcast %5 : vector<1x128xf32> to vector<128x128xf32>
    %7 = arith.addf %3, %6 : vector<128x128xf32>
    %cst_7 = arith.constant 0.000000e+00 : f32
    %8 = vector.broadcast %cst_7 : f32 to vector<128x128xf32>
    %9 = arith.maximumf %7, %8 : vector<128x128xf32>
    %c1 = arith.constant 1 : index
    %c0_8 = arith.constant 0 : index
    %c0_9 = arith.constant 0 : index
    %10 = vector.load %arg2[%c1, %c0_8, %c0_9] : memref<6x128x128xf32, #tpu.memory_space<vmem>>, vector<1x128x128xf32>
    %11 = vector.shape_cast %10 : vector<1x128x128xf32> to vector<128x128xf32>
    %cst_10 = arith.constant dense<0.000000e+00> : vector<128x128xf32>
    %12 = tpu.matmul %9, %11, %cst_10 {dimension_numbers = #tpu.dot_dimension_numbers<[1], [0], [0], [1], [0, 0, 1, 1], [], []>} : vector<128x128xf32>, vector<128x128xf32>, vector<128x128xf32> -> vector<128x128xf32>
    %c1_11 = arith.constant 1 : index
    %c0_12 = arith.constant 0 : index
    %c0_13 = arith.constant 0 : index
    %13 = vector.load %arg3[%c1_11, %c0_12, %c0_13] : memref<6x1x128xf32, #tpu.memory_space<vmem>>, vector<1x1x128xf32>
    %14 = vector.shape_cast %13 : vector<1x1x128xf32> to vector<1x128xf32>
    %15 = vector.broadcast %14 : vector<1x128xf32> to vector<128x128xf32>
    %16 = arith.addf %12, %15 : vector<128x128xf32>
    %cst_14 = arith.constant 0.000000e+00 : f32
    %17 = vector.broadcast %cst_14 : f32 to vector<128x128xf32>
    %18 = arith.maximumf %16, %17 : vector<128x128xf32>
    %c2 = arith.constant 2 : index
    %c0_15 = arith.constant 0 : index
    %c0_16 = arith.constant 0 : index
    %19 = vector.load %arg2[%c2, %c0_15, %c0_16] : memref<6x128x128xf32, #tpu.memory_space<vmem>>, vector<1x128x128xf32>
    %20 = vector.shape_cast %19 : vector<1x128x128xf32> to vector<128x128xf32>
    %cst_17 = arith.constant dense<0.000000e+00> : vector<128x128xf32>
    %21 = tpu.matmul %18, %20, %cst_17 {dimension_numbers = #tpu.dot_dimension_numbers<[1], [0], [0], [1], [0, 0, 1, 1], [], []>} : vector<128x128xf32>, vector<128x128xf32>, vector<128x128xf32> -> vector<128x128xf32>
    %c2_18 = arith.constant 2 : index
    %c0_19 = arith.constant 0 : index
    %c0_20 = arith.constant 0 : index
    %22 = vector.load %arg3[%c2_18, %c0_19, %c0_20] : memref<6x1x128xf32, #tpu.memory_space<vmem>>, vector<1x1x128xf32>
    %23 = vector.shape_cast %22 : vector<1x1x128xf32> to vector<1x128xf32>
    %24 = vector.broadcast %23 : vector<1x128xf32> to vector<128x128xf32>
    %25 = arith.addf %21, %24 : vector<128x128xf32>
    %cst_21 = arith.constant 0.000000e+00 : f32
    %26 = vector.broadcast %cst_21 : f32 to vector<128x128xf32>
    %27 = arith.maximumf %25, %26 : vector<128x128xf32>
    %c3 = arith.constant 3 : index
    %c0_22 = arith.constant 0 : index
    %c0_23 = arith.constant 0 : index
    %28 = vector.load %arg2[%c3, %c0_22, %c0_23] : memref<6x128x128xf32, #tpu.memory_space<vmem>>, vector<1x128x128xf32>
    %29 = vector.shape_cast %28 : vector<1x128x128xf32> to vector<128x128xf32>
    %cst_24 = arith.constant dense<0.000000e+00> : vector<128x128xf32>
    %30 = tpu.matmul %27, %29, %cst_24 {dimension_numbers = #tpu.dot_dimension_numbers<[1], [0], [0], [1], [0, 0, 1, 1], [], []>} : vector<128x128xf32>, vector<128x128xf32>, vector<128x128xf32> -> vector<128x128xf32>
    %c3_25 = arith.constant 3 : index
    %c0_26 = arith.constant 0 : index
    %c0_27 = arith.constant 0 : index
    %31 = vector.load %arg3[%c3_25, %c0_26, %c0_27] : memref<6x1x128xf32, #tpu.memory_space<vmem>>, vector<1x1x128xf32>
    %32 = vector.shape_cast %31 : vector<1x1x128xf32> to vector<1x128xf32>
    %33 = vector.broadcast %32 : vector<1x128xf32> to vector<128x128xf32>
    %34 = arith.addf %30, %33 : vector<128x128xf32>
    %cst_28 = arith.constant 0.000000e+00 : f32
    %35 = vector.broadcast %cst_28 : f32 to vector<128x128xf32>
    %36 = arith.maximumf %34, %35 : vector<128x128xf32>
    %c4 = arith.constant 4 : index
    %c0_29 = arith.constant 0 : index
    %c0_30 = arith.constant 0 : index
    %37 = vector.load %arg2[%c4, %c0_29, %c0_30] : memref<6x128x128xf32, #tpu.memory_space<vmem>>, vector<1x128x128xf32>
    %38 = vector.shape_cast %37 : vector<1x128x128xf32> to vector<128x128xf32>
    %cst_31 = arith.constant dense<0.000000e+00> : vector<128x128xf32>
    %39 = tpu.matmul %36, %38, %cst_31 {dimension_numbers = #tpu.dot_dimension_numbers<[1], [0], [0], [1], [0, 0, 1, 1], [], []>} : vector<128x128xf32>, vector<128x128xf32>, vector<128x128xf32> -> vector<128x128xf32>
    %c4_32 = arith.constant 4 : index
    %c0_33 = arith.constant 0 : index
    %c0_34 = arith.constant 0 : index
    %40 = vector.load %arg3[%c4_32, %c0_33, %c0_34] : memref<6x1x128xf32, #tpu.memory_space<vmem>>, vector<1x1x128xf32>
    %41 = vector.shape_cast %40 : vector<1x1x128xf32> to vector<1x128xf32>
    %42 = vector.broadcast %41 : vector<1x128xf32> to vector<128x128xf32>
    %43 = arith.addf %39, %42 : vector<128x128xf32>
    %cst_35 = arith.constant 0.000000e+00 : f32
    %44 = vector.broadcast %cst_35 : f32 to vector<128x128xf32>
    %45 = arith.maximumf %43, %44 : vector<128x128xf32>
    %c5 = arith.constant 5 : index
    %c0_36 = arith.constant 0 : index
    %c0_37 = arith.constant 0 : index
    %46 = vector.load %arg2[%c5, %c0_36, %c0_37] : memref<6x128x128xf32, #tpu.memory_space<vmem>>, vector<1x128x128xf32>
    %47 = vector.shape_cast %46 : vector<1x128x128xf32> to vector<128x128xf32>
    %cst_38 = arith.constant dense<0.000000e+00> : vector<128x128xf32>
    %48 = tpu.matmul %45, %47, %cst_38 {dimension_numbers = #tpu.dot_dimension_numbers<[1], [0], [0], [1], [0, 0, 1, 1], [], []>} : vector<128x128xf32>, vector<128x128xf32>, vector<128x128xf32> -> vector<128x128xf32>
    %c5_39 = arith.constant 5 : index
    %c0_40 = arith.constant 0 : index
    %c0_41 = arith.constant 0 : index
    %49 = vector.load %arg3[%c5_39, %c0_40, %c0_41] : memref<6x1x128xf32, #tpu.memory_space<vmem>>, vector<1x1x128xf32>
    %50 = vector.shape_cast %49 : vector<1x1x128xf32> to vector<1x128xf32>
    %51 = vector.broadcast %50 : vector<1x128xf32> to vector<128x128xf32>
    %52 = arith.addf %48, %51 : vector<128x128xf32>
    %c0_42 = arith.constant 0 : index
    %c0_43 = arith.constant 0 : index
    %53 = vector.load %arg4[%c0_42, %c0_43] : memref<128x128xf32, #tpu.memory_space<vmem>>, vector<128x128xf32>
    tpu.vector_store %arg4[%c0_42, %c0_43], %52 {strides = array<i32>} : memref<128x128xf32, #tpu.memory_space<vmem>>, vector<128x128xf32>,
    return
  }
  func.func @transform_0(%arg0: i32) -> (i32, i32) {
    %c0_i32 = arith.constant 0 : i32
    %c0_i32_0 = arith.constant 0 : i32
    return %arg0, %c0_i32 : i32, i32
  }
  func.func @transform_1(%arg0: i32) -> (i32, i32, i32) {
    %c0_i32 = arith.constant 0 : i32
    %c0_i32_0 = arith.constant 0 : i32
    %c0_i32_1 = arith.constant 0 : i32
    %c0_i32_2 = arith.constant 0 : i32
    return %c0_i32, %c0_i32_0, %c0_i32_1 : i32, i32, i32
  }
  func.func @transform_2(%arg0: i32) -> (i32, i32, i32) {
    %c0_i32 = arith.constant 0 : i32
    %c0_i32_0 = arith.constant 0 : i32
    %c0_i32_1 = arith.constant 0 : i32
    %c0_i32_2 = arith.constant 0 : i32
    return %c0_i32, %c0_i32_0, %c0_i32_1 : i32, i32, i32
  }
  func.func @transform_3(%arg0: i32) -> (i32, i32) {
    %c0_i32 = arith.constant 0 : i32
    %c0_i32_0 = arith.constant 0 : i32
    return %arg0, %c0_i32 : i32, i32
  }
}

</mosaic_0001>

<bundles_post_ra>
// kernel: tpu_custom_call.1
= control target key start
LH: loop header
LB: loop body
LE: loop exit
PB: predicated region body
PF: predicated region fallthrough
CT: control target
= control target key end

     0   :  { %8 = vsyncpa [#allocation3], 0  ;;  %s1881_s0 = inlined_call_operand.hbm [shape: f32[128,128], index: 0, kind: input, shape index: {}]   ;;  %s1882_s1 = inlined_call_operand.hbm [shape: f32[6,128,128], index: 1, kind: input, shape index: {}]   ;;  %s1883_s2 = inlined_call_operand.hbm [shape: f32[6,1,128], index: 2, kind: input, shape index: {}]   ;;  %s1884_s3 = inlined_call_operand.hbm [shape: f32[128,128], index: 3, kind: output, shape index: {}]  }
   0x1   :  { %9 = vsyncpa [#allocation6], 0 }
   0x2   :  { %10 = vsyncpa [#allocation4], 0  ;;  %s1832_s12 = smov [#allocation5]   ;;  %s1833_s14 = smov [#allocation2]  }
   0x3   :  { %s28_s13 = sshll.u32 %s1832_s12, 4  ;;  %s16_s15 = sshll.u32 %s1833_s14, 4  ;;  %s29_s13 = int_to_ptr.vmem [resolvable:$true] %s28_s13  ;;  %s17_s15 = int_to_ptr.vmem [resolvable:$true] %s16_s15 }
   0x4   :  { %s1754_s16 = scalar_lea.vmem %s29_s13, 12288  ;;  %p1759_p1 = scmp.lt.s32.totalorder %s29_s13, %s29_s13 }
   0x5   :  { %p1755_p0 = scmp.ne.s32.totalorder %s29_s13, %s1754_s16  ;;  %p1760_p2 = scmp.lt.s32.totalorder %s1754_s16, %s1754_s16 }
   0x7   :  { %p1761_p3 = por %p1760_p2, %p1759_p1 }
   0x9   :  { %p1762_p4 = pnand %p1761_p3, %p1755_p0 }
   0xb   :  { %1765 = shalt.err (!%p1762_p4)
}
   0xc   :  { %s1834_s17 = smov 128   ;;  %s1835_s18 = smov 8  }
   0xd   :  { %34 = dma.hbm_to_vmem [thread:$0]  %s1882_s1, 12288, %s29_s13, [#allocation6], %s1834_s17, %s1834_s17, %s1835_s18  }
   0xe   :  { %s1774_s21 = scalar_lea.vmem %s17_s15, 2048  ;;  %p1779_p6 = scmp.lt.s32.totalorder %s17_s15, %s17_s15 }
   0xf   :  { %p1775_p5 = scmp.ne.s32.totalorder %s17_s15, %s1774_s21  ;;  %p1780_p7 = scmp.lt.s32.totalorder %s1774_s21, %s1774_s21 }
  0x11   :  { %p1781_p8 = por %p1780_p7, %p1779_p6 }
  0x13   :  { %p1782_p9 = pnand %p1781_p8, %p1775_p5 }
  0x15   :  { %1785 = shalt.err (!%p1782_p9)
}
  0x16   :  { %22 = dma.hbm_to_vmem [thread:$0]  %s1881_s0, 2048, %s17_s15, [#allocation3], %s1834_s17, %s1834_s17, %s1835_s18  }
  0x17   :  { %s1836_s24 = smov [#allocation7]  }
  0x18   :  { %s40_s25 = sshll.u32 %s1836_s24, 4  ;;  %s41_s25 = int_to_ptr.vmem [resolvable:$true] %s40_s25 }
  0x19   :  { %s1794_s26 = scalar_lea.vmem %s41_s25, 96  ;;  %p1799_p11 = scmp.lt.s32.totalorder %s41_s25, %s41_s25 }
  0x1a   :  { %p1795_p10 = scmp.ne.s32.totalorder %s41_s25, %s1794_s26  ;;  %p1800_p12 = scmp.lt.s32.totalorder %s1794_s26, %s1794_s26 }
  0x1c   :  { %p1801_p13 = por %p1800_p12, %p1799_p11 }
  0x1e   :  { %p1802_p0 = pnand %p1801_p13, %p1795_p10 }
  0x20   :  { %1805 = shalt.err (!%p1802_p0)
}
  0x21   :  { %s1837_s1 = smov 16   ;;  %s1838_s27 = smov 1  }
  0x22   :  { %46 = dma.hbm_to_vmem [thread:$0]  %s1883_s2, 96, %s41_s25, [#allocation6], %s1837_s1, %s1837_s1, %s1838_s27  }
  0x23   :  { %1826 = dma.done.wait [#allocation3], 2048  }
  0x24   :  { %1827 = vsyncadd [#allocation3], 4294965248 }
  0x25   :  { %1828 = dma.done.wait [#allocation6], 12384  }
  0x26   :  { %1829 = vsyncadd [#allocation6], 4294954912  ;;  %v87_v0 = vld [vmem:[#allocation5 + $0x78] sm:$0xff]  ;;  %v86_v1 = vld [vmem:[#allocation5 + $0x70] sm:$0xff]  ;;  %s1839_s0 = smov [#allocation8]  }
  0x27   :  { %1402 = vmatprep.subr.mxu0 %v87_v0  ;;  %v85_v2 = vld [vmem:[#allocation5 + $0x68] sm:$0xff]  ;;  %v84_v3 = vld [vmem:[#allocation5 + $0x60] sm:$0xff]  ;;  %v83_v5 = vld [vmem:[#allocation5 + $0x58] sm:$0xff]  ;;  %s1191_s2 = sshll.u32 %s1839_s0, 4  ;;  %s1192_s2 = int_to_ptr.vmem [resolvable:$true] %s1191_s2 }
  0x28   :  { %1403 = vmatpush3.msra.mxu0 %v87_v0  ;;  %v56_v4 = vld [vmem:[#allocation2] sm:$0xff]  ;;  %v82_v6 = vld [vmem:[#allocation5 + $0x50] sm:$0xff]  ;;  %v81_v7 = vld [vmem:[#allocation5 + $0x48] sm:$0xff]  ;;  %s1806_s30 = scalar_lea.vmem %s1192_s2, 2048  ;;  %p1811_p2 = scmp.lt.s32.totalorder %s1192_s2, %s1192_s2 }
  0x29   :  { %1404 = vmatprep.subr.mxu0 %v86_v1  ;;  %1434 = vmatprep.mubr.f32.mxu0 %v56_v4  ;;  %v272_v8 = vld [vmem:[#allocation5 + $0xf8] sm:$0xff]  ;;  %v271_v9 = vld [vmem:[#allocation5 + $0xf0] sm:$0xff]  ;;  %v80_v10 = vld [vmem:[#allocation5 + $0x40] sm:$0xff]  ;;  %p1807_p1 = scmp.ne.s32.totalorder %s1192_s2, %s1806_s30  ;;  %p1812_p3 = scmp.lt.s32.totalorder %s1806_s30, %s1806_s30 }
  0x2a   :  { %1405 = vmatpush3.msra.mxu0 %v86_v1  ;;  %1458 = vmatprep.subr.mxu1 %v272_v8  ;;  %v270_v11 = vld [vmem:[#allocation5 + $0xe8] sm:$0xff]  ;;  %v79_v12 = vld [vmem:[#allocation5 + $0x38] sm:$0xff]  ;;  %v269_v13 = vld [vmem:[#allocation5 + $0xe0] sm:$0xff] }
  0x2b   :  { %1406 = vmatprep.subr.mxu0 %v85_v2  ;;  %1459 = vmatpush3.msra.mxu1 %v272_v8  ;;  %v78_v14 = vld [vmem:[#allocation5 + $0x30] sm:$0xff]  ;;  %v268_v15 = vld [vmem:[#allocation5 + $0xd8] sm:$0xff]  ;;  %v77_v16 = vld [vmem:[#allocation5 + $0x28] sm:$0xff]  ;;  %p1813_p4 = por %p1812_p3, %p1811_p2 }
  0x2c   :  { %1407 = vmatpush3.msra.mxu0 %v85_v2  ;;  %1460 = vmatprep.subr.mxu1 %v271_v9  ;;  %v267_v17 = vld [vmem:[#allocation5 + $0xd0] sm:$0xff]  ;;  %v76_v18 = vld [vmem:[#allocation5 + $0x20] sm:$0xff]  ;;  %v266_v19 = vld [vmem:[#allocation5 + $0xc8] sm:$0xff] }
  0x2d   :  { %1408 = vmatprep.subr.mxu0 %v84_v3  ;;  %1461 = vmatpush3.msra.mxu1 %v271_v9  ;;  %v75_v20 = vld [vmem:[#allocation5 + $0x18] sm:$0xff]  ;;  %v265_v21 = vld [vmem:[#allocation5 + $0xc0] sm:$0xff]  ;;  %v74_v22 = vld [vmem:[#allocation5 + $0x10] sm:$0xff]  ;;  %p1814_p5 = pnand %p1813_p4, %p1807_p1 }
  0x2e   :  { %1409 = vmatpush3.msra.mxu0 %v84_v3  ;;  %1462 = vmatprep.subr.mxu1 %v270_v11  ;;  %v264_v23 = vld [vmem:[#allocation5 + $0xb8] sm:$0xff]  ;;  %v73_v24 = vld [vmem:[#allocation5 + $0x8] sm:$0xff]  ;;  %v263_v25 = vld [vmem:[#allocation5 + $0xb0] sm:$0xff] }
  0x2f   :  { %1410 = vmatprep.subr.mxu0 %v83_v5  ;;  %1463 = vmatpush3.msra.mxu1 %v270_v11  ;;  %v72_v26 = vld [vmem:[#allocation5] sm:$0xff]  ;;  %v262_v27 = vld [vmem:[#allocation5 + $0xa8] sm:$0xff]  ;;  %v58_v30 = vld [vmem:[#allocation2 + $0x10] sm:$0xff] }
  0x30   :  { %1411 = vmatpush3.msra.mxu0 %v83_v5  ;;  %1464 = vmatprep.subr.mxu1 %v269_v13  ;;  %v57_v28 = vld [vmem:[#allocation2 + $0x8] sm:$0xff]  ;;  %v261_v29 = vld [vmem:[#allocation5 + $0xa0] sm:$0xff]  ;;  %v59_v31 = vld [vmem:[#allocation2 + $0x18] sm:$0xff] }
  0x31   :  { %1412 = vmatprep.subr.mxu0 %v82_v6  ;;  %1465 = vmatpush3.msra.mxu1 %v269_v13  ;;  %v60_v32 = vld [vmem:[#allocation2 + $0x20] sm:$0xff]  ;;  %v61_v33 = vld [vmem:[#allocation2 + $0x28] sm:$0xff]  ;;  %v62_v34 = vld [vmem:[#allocation2 + $0x30] sm:$0xff] }
  0x32   :  { %1413 = vmatpush3.msra.mxu0 %v82_v6  ;;  %1466 = vmatprep.subr.mxu1 %v268_v15  ;;  %v63_v35 = vld [vmem:[#allocation2 + $0x38] sm:$0xff]  ;;  %v64_v36 = vld [vmem:[#allocation2 + $0x40] sm:$0xff]  ;;  %v65_v37 = vld [vmem:[#allocation2 + $0x48] sm:$0xff] }
  0x33   :  { %1414 = vmatprep.subr.mxu0 %v81_v7  ;;  %1467 = vmatpush3.msra.mxu1 %v268_v15  ;;  %v66_v38 = vld [vmem:[#allocation2 + $0x50] sm:$0xff]  ;;  %v67_v39 = vld [vmem:[#allocation2 + $0x58] sm:$0xff]  ;;  %v68_v40 = vld [vmem:[#allocation2 + $0x60] sm:$0xff] }
  0x34   :  { %1415 = vmatpush3.msra.mxu0 %v81_v7  ;;  %1468 = vmatprep.subr.mxu1 %v267_v17  ;;  %v69_v41 = vld [vmem:[#allocation2 + $0x68] sm:$0xff]  ;;  %v70_v42 = vld [vmem:[#allocation2 + $0x70] sm:$0xff]  ;;  %v71_v43 = vld [vmem:[#allocation2 + $0x78] sm:$0xff] }
  0x35   :  { %1416 = vmatprep.subr.mxu0 %v80_v10  ;;  %1469 = vmatpush3.msra.mxu1 %v267_v17  ;;  %v260_v44 = vld [vmem:[#allocation5 + $0x98] sm:$0xff]  ;;  %v259_v45 = vld [vmem:[#allocation5 + $0x90] sm:$0xff]  ;;  %v258_v46 = vld [vmem:[#allocation5 + $0x88] sm:$0xff] }
  0x36   :  { %1417 = vmatpush3.msra.mxu0 %v80_v10  ;;  %1470 = vmatprep.subr.mxu1 %v266_v19  ;;  %v257_v47 = vld [vmem:[#allocation5 + $0x80] sm:$0xff]  ;;  %v458_v48 = vld [vmem:[#allocation5 + $0x178] sm:$0xff]  ;;  %v457_v49 = vld [vmem:[#allocation5 + $0x170] sm:$0xff] }
  0x37   :  { %1418 = vmatprep.subr.mxu0 %v79_v12  ;;  %1471 = vmatpush3.msra.mxu1 %v266_v19  ;;  %v456_v50 = vld [vmem:[#allocation5 + $0x168] sm:$0xff]  ;;  %v455_v51 = vld [vmem:[#allocation5 + $0x160] sm:$0xff]  ;;  %v454_v52 = vld [vmem:[#allocation5 + $0x158] sm:$0xff] }
  0x38   :  { %1419 = vmatpush3.msra.mxu0 %v79_v12  ;;  %1472 = vmatprep.subr.mxu1 %v265_v21  ;;  %v453_v53 = vld [vmem:[#allocation5 + $0x150] sm:$0xff]  ;;  %v452_v54 = vld [vmem:[#allocation5 + $0x148] sm:$0xff]  ;;  %v451_v55 = vld [vmem:[#allocation5 + $0x140] sm:$0xff] }
  0x39   :  { %1420 = vmatprep.subr.mxu0 %v78_v14  ;;  %1473 = vmatpush3.msra.mxu1 %v265_v21  ;;  %v450_v56 = vld [vmem:[#allocation5 + $0x138] sm:$0xff]  ;;  %v449_v57 = vld [vmem:[#allocation5 + $0x130] sm:$0xff]  ;;  %v448_v58 = vld [vmem:[#allocation5 + $0x128] sm:$0xff] }
  0x3a   :  { %1421 = vmatpush3.msra.mxu0 %v78_v14  ;;  %1474 = vmatprep.subr.mxu1 %v264_v23  ;;  %v447_v59 = vld [vmem:[#allocation5 + $0x120] sm:$0xff]  ;;  %v446_v60 = vld [vmem:[#allocation5 + $0x118] sm:$0xff] }
  0x3b   :  { %1422 = vmatprep.subr.mxu0 %v77_v16  ;;  %1475 = vmatpush3.msra.mxu1 %v264_v23  ;;  %v1204_v61 = vld [vmem:[#allocation7] ss:$0 sm:$0xff] }
  0x3c   :  { %1423 = vmatpush3.msra.mxu0 %v77_v16  ;;  %1476 = vmatprep.subr.mxu1 %v263_v25 }
  0x3d   :  { %1424 = vmatprep.subr.mxu0 %v76_v18  ;;  %1477 = vmatpush3.msra.mxu1 %v263_v25 }
  0x3e   :  { %1425 = vmatpush3.msra.mxu0 %v76_v18  ;;  %1478 = vmatprep.subr.mxu1 %v262_v27 }
  0x3f   :  { %1426 = vmatprep.subr.mxu0 %v75_v20  ;;  %1479 = vmatpush3.msra.mxu1 %v262_v27 }
  0x40   :  { %1427 = vmatpush3.msra.mxu0 %v75_v20  ;;  %1480 = vmatprep.subr.mxu1 %v261_v29 }
  0x41   :  { %1428 = vmatprep.subr.mxu0 %v74_v22  ;;  %1481 = vmatpush3.msra.mxu1 %v261_v29 }
  0x42   :  { %1429 = vmatpush3.msra.mxu0 %v74_v22  ;;  %1482 = vmatprep.subr.mxu1 %v260_v44 }
  0x43   :  { %1430 = vmatprep.subr.mxu0 %v73_v24  ;;  %1483 = vmatpush3.msra.mxu1 %v260_v44 }
  0x44   :  { %1431 = vmatpush3.msra.mxu0 %v73_v24  ;;  %1484 = vmatprep.subr.mxu1 %v259_v45 }
  0x45   :  { %1432 = vmatprep.subr.mxu0 %v72_v26  ;;  %1485 = vmatpush3.msra.mxu1 %v259_v45 }
  0x46   :  { %1433 = vmatpush3.msra.mxu0 %v72_v26  ;;  %1486 = vmatprep.subr.mxu1 %v258_v46 }
  0x47   :  { %1435 = vmatmul.mubr.f32.vlgmr.msra.gmra.mxu0 %v57_v28  ;;  %1487 = vmatpush3.msra.mxu1 %v258_v46  ;;  %v445_v46 = vld [vmem:[#allocation5 + $0x110] sm:$0xff] }
  0x48   :  { %1437 = vmatprep.mubr.f32.mxu0 %v58_v30  ;;  %1488 = vmatprep.subr.mxu1 %v257_v47 }
  0x49   :  { %1489 = vmatpush3.msra.mxu1 %v257_v47  ;;  %1514 = vmatprep.subr.mxu0 %v458_v48  ;;  %v444_v47 = vld [vmem:[#allocation5 + $0x108] sm:$0xff] }
  0x4a   :  { %1515 = vmatpush3.msra.mxu0 %v458_v48  ;;  %v443_v48 = vld [vmem:[#allocation5 + $0x100] sm:$0xff] }
  0x4b   :  { %1438 = vmatmul.mubr.f32.gmra.mxu0 %v59_v31  ;;  %1516 = vmatprep.subr.mxu0 %v457_v49 }
  0x4c   :  { %1440 = vmatprep.mubr.f32.mxu0 %v60_v32  ;;  %1517 = vmatpush3.msra.mxu0 %v457_v49  ;;  %v644_v49 = vld [vmem:[#allocation5 + $0x1f8] sm:$0xff] }
  0x4d   :  { %1518 = vmatprep.subr.mxu0 %v456_v50  ;;  %1570 = vmatprep.subr.mxu1 %v644_v49 }
  0x4e   :  { %1519 = vmatpush3.msra.mxu0 %v456_v50  ;;  %v643_v50 = vld [vmem:[#allocation5 + $0x1f0] sm:$0xff] }
  0x4f   :  { %1441 = vmatmul.mubr.f32.gmra.mxu0 %v61_v33  ;;  %1520 = vmatprep.subr.mxu0 %v455_v51 }
  0x50   :  { %1443 = vmatprep.mubr.f32.mxu0 %v62_v34  ;;  %1521 = vmatpush3.msra.mxu0 %v455_v51  ;;  %v642_v51 = vld [vmem:[#allocation5 + $0x1e8] sm:$0xff] }
  0x51   :  { %1522 = vmatprep.subr.mxu0 %v454_v52 }
  0x52   :  { %1523 = vmatpush3.msra.mxu0 %v454_v52  ;;  %v641_v52 = vld [vmem:[#allocation5 + $0x1e0] sm:$0xff] }
  0x53   :  { %1444 = vmatmul.mubr.f32.gmra.mxu0 %v63_v35  ;;  %1524 = vmatprep.subr.mxu0 %v453_v53 }
  0x54   :  { %1446 = vmatprep.mubr.f32.mxu0 %v64_v36  ;;  %1525 = vmatpush3.msra.mxu0 %v453_v53  ;;  %v640_v53 = vld [vmem:[#allocation5 + $0x1d8] sm:$0xff] }
  0x55   :  { %1526 = vmatprep.subr.mxu0 %v452_v54 }
  0x56   :  { %1527 = vmatpush3.msra.mxu0 %v452_v54  ;;  %v639_v54 = vld [vmem:[#allocation5 + $0x1d0] sm:$0xff] }
  0x57   :  { %1447 = vmatmul.mubr.f32.gmra.mxu0 %v65_v37  ;;  %1528 = vmatprep.subr.mxu0 %v451_v55 }
  0x58   :  { %1449 = vmatprep.mubr.f32.mxu0 %v66_v38  ;;  %1529 = vmatpush3.msra.mxu0 %v451_v55  ;;  %v638_v55 = vld [vmem:[#allocation5 + $0x1c8] sm:$0xff] }
  0x59   :  { %1530 = vmatprep.subr.mxu0 %v450_v56 }
  0x5a   :  { %1531 = vmatpush3.msra.mxu0 %v450_v56  ;;  %v637_v56 = vld [vmem:[#allocation5 + $0x1c0] sm:$0xff] }
  0x5b   :  { %1450 = vmatmul.mubr.f32.gmra.mxu0 %v67_v39  ;;  %1532 = vmatprep.subr.mxu0 %v449_v57 }
  0x5c   :  { %1452 = vmatprep.mubr.f32.mxu0 %v68_v40  ;;  %1533 = vmatpush3.msra.mxu0 %v449_v57  ;;  %v636_v57 = vld [vmem:[#allocation5 + $0x1b8] sm:$0xff] }
  0x5d   :  { %1534 = vmatprep.subr.mxu0 %v448_v58 }
  0x5e   :  { %1535 = vmatpush3.msra.mxu0 %v448_v58  ;;  %v635_v58 = vld [vmem:[#allocation5 + $0x1b0] sm:$0xff] }
  0x5f   :  { %1453 = vmatmul.mubr.f32.gmra.mxu0 %v69_v41  ;;  %1536 = vmatprep.subr.mxu0 %v447_v59 }
  0x60   :  { %1455 = vmatprep.mubr.f32.mxu0 %v70_v42  ;;  %1537 = vmatpush3.msra.mxu0 %v447_v59  ;;  %v634_v59 = vld [vmem:[#allocation5 + $0x1a8] sm:$0xff] }
  0x61   :  { %1538 = vmatprep.subr.mxu0 %v446_v60 }
  0x62   :  { %1539 = vmatpush3.msra.mxu0 %v446_v60  ;;  %v633_v60 = vld [vmem:[#allocation5 + $0x1a0] sm:$0xff] }
  0x63   :  { %1456 = vmatmul.mubr.f32.gmra.mxu0 %v71_v43  ;;  %1540 = vmatprep.subr.mxu0 %v445_v46 }
  0x64   :  { %1541 = vmatpush3.msra.mxu0 %v445_v46 }
  0x65   :  { %1542 = vmatprep.subr.mxu0 %v444_v47 }
  0x66   :  { %1543 = vmatpush3.msra.mxu0 %v444_v47  ;;  %v631_v47 = vld [vmem:[#allocation5 + $0x190] sm:$0xff] }
  0x67   :  { %1544 = vmatprep.subr.mxu0 %v443_v48 }
  0x68   :  { %1545 = vmatpush3.msra.mxu0 %v443_v48  ;;  %v630_v48 = vld [vmem:[#allocation5 + $0x188] sm:$0xff] }
 0x107   :  { %v1436_v62 = vpop.f32.mrf.mxu0 }
 0x108   :  { %v167_v63 = vadd.f32 %v1436_v62, %v1204_v61  ;;  %v1205_v62 = vld [vmem:[#allocation7 + $0x1] ss:$0 sm:$0xff] }
 0x109   :  { %v161_v0 = vpop.f32.mrf.mxu0 }
 0x10a   :  { %v162_v1 = vadd.f32 %v1204_v61, %v161_v0  ;;  %v241_v4 = vmax.f32 %v167_v63, 0.0 }
 0x10b   :  { %v1439_v2 = vpop.f32.mrf.mxu0 }
 0x10c   :  { %v240_v3 = vmax.f32 %v162_v1, 0.0  ;;  %v177_v5 = vadd.f32 %v1439_v2, %v1204_v61 }
 0x10d   :  { %v171_v6 = vpop.f32.mrf.mxu0 }
 0x10e   :  { %v172_v7 = vadd.f32 %v1204_v61, %v171_v6  ;;  %1490 = vmatprep.mubr.f32.mxu1 %v240_v3  ;;  %v243_v10 = vmax.f32 %v177_v5, 0.0 }
 0x10f   :  { %v1442_v8 = vpop.f32.mrf.mxu0  ;;  %1491 = vmatmul.mubr.f32.vlgmr.msra.gmra.mxu1 %v241_v4 }
 0x110   :  { %v242_v9 = vmax.f32 %v172_v7, 0.0  ;;  %v187_v11 = vadd.f32 %v1442_v8, %v1204_v61  ;;  %1571 = vmatpush3.msra.mxu1 %v644_v49  ;;  %v629_v49 = vld [vmem:[#allocation5 + $0x180] sm:$0xff] }
 0x111   :  { %v181_v12 = vpop.f32.mrf.mxu0  ;;  %1572 = vmatprep.subr.mxu1 %v643_v50 }
 0x112   :  { %v182_v13 = vadd.f32 %v1204_v61, %v181_v12  ;;  %1493 = vmatprep.mubr.f32.mxu1 %v242_v9  ;;  %v245_v16 = vmax.f32 %v187_v11, 0.0  ;;  %1573 = vmatpush3.msra.mxu1 %v643_v50  ;;  %v830_v50 = vld [vmem:[#allocation5 + $0x278] sm:$0xff] }
 0x113   :  { %v1445_v14 = vpop.f32.mrf.mxu0  ;;  %1494 = vmatmul.mubr.f32.gmra.mxu1 %v243_v10  ;;  %1574 = vmatprep.subr.mxu1 %v642_v51 }
 0x114   :  { %v244_v15 = vmax.f32 %v182_v13, 0.0  ;;  %v197_v17 = vadd.f32 %v1445_v14, %v1204_v61  ;;  %1575 = vmatpush3.msra.mxu1 %v642_v51  ;;  %v829_v51 = vld [vmem:[#allocation5 + $0x270] sm:$0xff]  ;;  %1626 = vmatprep.subr.mxu0 %v830_v50 }
 0x115   :  { %v191_v18 = vpop.f32.mrf.mxu0  ;;  %1576 = vmatprep.subr.mxu1 %v641_v52 }
 0x116   :  { %v192_v19 = vadd.f32 %v1204_v61, %v191_v18  ;;  %1496 = vmatprep.mubr.f32.mxu1 %v244_v15  ;;  %v247_v22 = vmax.f32 %v197_v17, 0.0  ;;  %1577 = vmatpush3.msra.mxu1 %v641_v52  ;;  %v828_v52 = vld [vmem:[#allocation5 + $0x268] sm:$0xff] }
 0x117   :  { %v1448_v20 = vpop.f32.mrf.mxu0  ;;  %1497 = vmatmul.mubr.f32.gmra.mxu1 %v245_v16  ;;  %1578 = vmatprep.subr.mxu1 %v640_v53 }
 0x118   :  { %v246_v21 = vmax.f32 %v192_v19, 0.0  ;;  %v207_v23 = vadd.f32 %v1448_v20, %v1204_v61  ;;  %1579 = vmatpush3.msra.mxu1 %v640_v53  ;;  %v827_v53 = vld [vmem:[#allocation5 + $0x260] sm:$0xff] }
 0x119   :  { %v201_v24 = vpop.f32.mrf.mxu0  ;;  %1580 = vmatprep.subr.mxu1 %v639_v54 }
 0x11a   :  { %v202_v25 = vadd.f32 %v1204_v61, %v201_v24  ;;  %1499 = vmatprep.mubr.f32.mxu1 %v246_v21  ;;  %v249_v28 = vmax.f32 %v207_v23, 0.0  ;;  %1581 = vmatpush3.msra.mxu1 %v639_v54  ;;  %v826_v54 = vld [vmem:[#allocation5 + $0x258] sm:$0xff] }
 0x11b   :  { %v1451_v26 = vpop.f32.mrf.mxu0  ;;  %1500 = vmatmul.mubr.f32.gmra.mxu1 %v247_v22  ;;  %1582 = vmatprep.subr.mxu1 %v638_v55 }
 0x11c   :  { %v248_v27 = vmax.f32 %v202_v25, 0.0  ;;  %v217_v29 = vadd.f32 %v1451_v26, %v1204_v61  ;;  %1583 = vmatpush3.msra.mxu1 %v638_v55  ;;  %v825_v55 = vld [vmem:[#allocation5 + $0x250] sm:$0xff] }
 0x11d   :  { %v211_v30 = vpop.f32.mrf.mxu0  ;;  %1584 = vmatprep.subr.mxu1 %v637_v56 }
 0x11e   :  { %v212_v31 = vadd.f32 %v1204_v61, %v211_v30  ;;  %1502 = vmatprep.mubr.f32.mxu1 %v248_v27  ;;  %v251_v34 = vmax.f32 %v217_v29, 0.0  ;;  %1585 = vmatpush3.msra.mxu1 %v637_v56  ;;  %v824_v56 = vld [vmem:[#allocation5 + $0x248] sm:$0xff] }
 0x11f   :  { %v1454_v32 = vpop.f32.mrf.mxu0  ;;  %1503 = vmatmul.mubr.f32.gmra.mxu1 %v249_v28  ;;  %1586 = vmatprep.subr.mxu1 %v636_v57 }
 0x120   :  { %v250_v33 = vmax.f32 %v212_v31, 0.0  ;;  %v227_v35 = vadd.f32 %v1454_v32, %v1204_v61  ;;  %1587 = vmatpush3.msra.mxu1 %v636_v57  ;;  %v823_v57 = vld [vmem:[#allocation5 + $0x240] sm:$0xff] }
 0x121   :  { %v221_v36 = vpop.f32.mrf.mxu0  ;;  %1588 = vmatprep.subr.mxu1 %v635_v58 }
 0x122   :  { %v222_v37 = vadd.f32 %v1204_v61, %v221_v36  ;;  %1505 = vmatprep.mubr.f32.mxu1 %v250_v33  ;;  %v253_v40 = vmax.f32 %v227_v35, 0.0  ;;  %1589 = vmatpush3.msra.mxu1 %v635_v58  ;;  %v822_v58 = vld [vmem:[#allocation5 + $0x238] sm:$0xff] }
 0x123   :  { %v1457_v38 = vpop.f32.mrf.mxu0  ;;  %1506 = vmatmul.mubr.f32.gmra.mxu1 %v251_v34  ;;  %1590 = vmatprep.subr.mxu1 %v634_v59 }
 0x124   :  { %v252_v39 = vmax.f32 %v222_v37, 0.0  ;;  %v237_v41 = vadd.f32 %v1457_v38, %v1204_v61  ;;  %1591 = vmatpush3.msra.mxu1 %v634_v59  ;;  %v821_v59 = vld [vmem:[#allocation5 + $0x230] sm:$0xff] }
 0x125   :  { %v231_v42 = vpop.f32.mrf.mxu0  ;;  %1592 = vmatprep.subr.mxu1 %v633_v60 }
 0x126   :  { %v232_v43 = vadd.f32 %v1204_v61, %v231_v42  ;;  %1508 = vmatprep.mubr.f32.mxu1 %v252_v39  ;;  %v255_v45 = vmax.f32 %v237_v41, 0.0  ;;  %v632_v61 = vld [vmem:[#allocation5 + $0x198] sm:$0xff]  ;;  %1593 = vmatpush3.msra.mxu1 %v633_v60  ;;  %v820_v60 = vld [vmem:[#allocation5 + $0x228] sm:$0xff] }
 0x127   :  { %1509 = vmatmul.mubr.f32.gmra.mxu1 %v253_v40  ;;  %1594 = vmatprep.subr.mxu1 %v632_v61 }
 0x128   :  { %v254_v44 = vmax.f32 %v232_v43, 0.0  ;;  %1595 = vmatpush3.msra.mxu1 %v632_v61  ;;  %v819_v61 = vld [vmem:[#allocation5 + $0x220] sm:$0xff] }
 0x129   :  { %1596 = vmatprep.subr.mxu1 %v631_v47 }
 0x12a   :  { %1511 = vmatprep.mubr.f32.mxu1 %v254_v44  ;;  %1597 = vmatpush3.msra.mxu1 %v631_v47 }
 0x12b   :  { %1512 = vmatmul.mubr.f32.gmra.mxu1 %v255_v45  ;;  %1598 = vmatprep.subr.mxu1 %v630_v48 }
 0x12c   :  { %1599 = vmatpush3.msra.mxu1 %v630_v48  ;;  %v817_v48 = vld [vmem:[#allocation5 + $0x210] sm:$0xff] }
 0x12d   :  { %1600 = vmatprep.subr.mxu1 %v629_v49 }
 0x12e   :  { %1601 = vmatpush3.msra.mxu1 %v629_v49  ;;  %v816_v49 = vld [vmem:[#allocation5 + $0x208] sm:$0xff] }
 0x1cf   :  { %v1492_v63 = vpop.f32.mrf.mxu1 }
 0x1d0   :  { %v353_v0 = vadd.f32 %v1492_v63, %v1205_v62  ;;  %v1206_v63 = vld [vmem:[#allocation7 + $0x2] ss:$0 sm:$0xff] }
 0x1d1   :  { %v347_v1 = vpop.f32.mrf.mxu1 }
 0x1d2   :  { %v348_v2 = vadd.f32 %v1205_v62, %v347_v1  ;;  %v427_v5 = vmax.f32 %v353_v0, 0.0 }
 0x1d3   :  { %v1495_v3 = vpop.f32.mrf.mxu1 }
 0x1d4   :  { %v426_v4 = vmax.f32 %v348_v2, 0.0  ;;  %v363_v6 = vadd.f32 %v1495_v3, %v1205_v62 }
 0x1d5   :  { %v357_v7 = vpop.f32.mrf.mxu1 }
 0x1d6   :  { %v358_v8 = vadd.f32 %v1205_v62, %v357_v7  ;;  %1546 = vmatprep.mubr.f32.mxu0 %v426_v4  ;;  %v429_v11 = vmax.f32 %v363_v6, 0.0 }
 0x1d7   :  { %v1498_v9 = vpop.f32.mrf.mxu1  ;;  %1547 = vmatmul.mubr.f32.vlgmr.msra.gmra.mxu0 %v427_v5 }
 0x1d8   :  { %v428_v10 = vmax.f32 %v358_v8, 0.0  ;;  %v373_v12 = vadd.f32 %v1498_v9, %v1205_v62  ;;  %1627 = vmatpush3.msra.mxu0 %v830_v50  ;;  %v815_v50 = vld [vmem:[#allocation5 + $0x200] sm:$0xff] }
 0x1d9   :  { %v367_v13 = vpop.f32.mrf.mxu1  ;;  %1628 = vmatprep.subr.mxu0 %v829_v51 }
 0x1da   :  { %v368_v14 = vadd.f32 %v1205_v62, %v367_v13  ;;  %1549 = vmatprep.mubr.f32.mxu0 %v428_v10  ;;  %v431_v17 = vmax.f32 %v373_v12, 0.0  ;;  %1629 = vmatpush3.msra.mxu0 %v829_v51  ;;  %v1016_v51 = vld [vmem:[#allocation5 + $0x2f8] sm:$0xff] }
 0x1db   :  { %v1501_v15 = vpop.f32.mrf.mxu1  ;;  %1550 = vmatmul.mubr.f32.gmra.mxu0 %v429_v11  ;;  %1630 = vmatprep.subr.mxu0 %v828_v52 }
 0x1dc   :  { %v430_v16 = vmax.f32 %v368_v14, 0.0  ;;  %v383_v18 = vadd.f32 %v1501_v15, %v1205_v62  ;;  %1631 = vmatpush3.msra.mxu0 %v828_v52  ;;  %v1015_v52 = vld [vmem:[#allocation5 + $0x2f0] sm:$0xff]  ;;  %1682 = vmatprep.subr.mxu1 %v1016_v51 }
 0x1dd   :  { %v377_v19 = vpop.f32.mrf.mxu1  ;;  %1632 = vmatprep.subr.mxu0 %v827_v53 }
 0x1de   :  { %v378_v20 = vadd.f32 %v1205_v62, %v377_v19  ;;  %1552 = vmatprep.mubr.f32.mxu0 %v430_v16  ;;  %v433_v23 = vmax.f32 %v383_v18, 0.0  ;;  %1633 = vmatpush3.msra.mxu0 %v827_v53  ;;  %v1014_v53 = vld [vmem:[#allocation5 + $0x2e8] sm:$0xff] }
 0x1df   :  { %v1504_v21 = vpop.f32.mrf.mxu1  ;;  %1553 = vmatmul.mubr.f32.gmra.mxu0 %v431_v17  ;;  %1634 = vmatprep.subr.mxu0 %v826_v54 }
 0x1e0   :  { %v432_v22 = vmax.f32 %v378_v20, 0.0  ;;  %v393_v24 = vadd.f32 %v1504_v21, %v1205_v62  ;;  %1635 = vmatpush3.msra.mxu0 %v826_v54  ;;  %v1013_v54 = vld [vmem:[#allocation5 + $0x2e0] sm:$0xff] }
 0x1e1   :  { %v387_v25 = vpop.f32.mrf.mxu1  ;;  %1636 = vmatprep.subr.mxu0 %v825_v55 }
 0x1e2   :  { %v388_v26 = vadd.f32 %v1205_v62, %v387_v25  ;;  %1555 = vmatprep.mubr.f32.mxu0 %v432_v22  ;;  %v435_v29 = vmax.f32 %v393_v24, 0.0  ;;  %1637 = vmatpush3.msra.mxu0 %v825_v55  ;;  %v1012_v55 = vld [vmem:[#allocation5 + $0x2d8] sm:$0xff] }
 0x1e3   :  { %v1507_v27 = vpop.f32.mrf.mxu1  ;;  %1556 = vmatmul.mubr.f32.gmra.mxu0 %v433_v23  ;;  %1638 = vmatprep.subr.mxu0 %v824_v56 }
 0x1e4   :  { %v434_v28 = vmax.f32 %v388_v26, 0.0  ;;  %v403_v30 = vadd.f32 %v1507_v27, %v1205_v62  ;;  %1639 = vmatpush3.msra.mxu0 %v824_v56  ;;  %v1011_v56 = vld [vmem:[#allocation5 + $0x2d0] sm:$0xff] }
 0x1e5   :  { %v397_v31 = vpop.f32.mrf.mxu1  ;;  %1640 = vmatprep.subr.mxu0 %v823_v57 }
 0x1e6   :  { %v398_v32 = vadd.f32 %v1205_v62, %v397_v31  ;;  %1558 = vmatprep.mubr.f32.mxu0 %v434_v28  ;;  %v437_v35 = vmax.f32 %v403_v30, 0.0  ;;  %1641 = vmatpush3.msra.mxu0 %v823_v57  ;;  %v1010_v57 = vld [vmem:[#allocation5 + $0x2c8] sm:$0xff] }
 0x1e7   :  { %v1510_v33 = vpop.f32.mrf.mxu1  ;;  %1559 = vmatmul.mubr.f32.gmra.mxu0 %v435_v29  ;;  %1642 = vmatprep.subr.mxu0 %v822_v58 }
 0x1e8   :  { %v436_v34 = vmax.f32 %v398_v32, 0.0  ;;  %v413_v36 = vadd.f32 %v1510_v33, %v1205_v62  ;;  %1643 = vmatpush3.msra.mxu0 %v822_v58  ;;  %v1009_v58 = vld [vmem:[#allocation5 + $0x2c0] sm:$0xff] }
 0x1e9   :  { %v407_v37 = vpop.f32.mrf.mxu1  ;;  %1644 = vmatprep.subr.mxu0 %v821_v59 }
 0x1ea   :  { %v408_v38 = vadd.f32 %v1205_v62, %v407_v37  ;;  %1561 = vmatprep.mubr.f32.mxu0 %v436_v34  ;;  %v439_v41 = vmax.f32 %v413_v36, 0.0  ;;  %1645 = vmatpush3.msra.mxu0 %v821_v59  ;;  %v1008_v59 = vld [vmem:[#allocation5 + $0x2b8] sm:$0xff] }
 0x1eb   :  { %v1513_v39 = vpop.f32.mrf.mxu1  ;;  %1562 = vmatmul.mubr.f32.gmra.mxu0 %v437_v35  ;;  %1646 = vmatprep.subr.mxu0 %v820_v60 }
 0x1ec   :  { %v438_v40 = vmax.f32 %v408_v38, 0.0  ;;  %v423_v42 = vadd.f32 %v1513_v39, %v1205_v62  ;;  %1647 = vmatpush3.msra.mxu0 %v820_v60  ;;  %v1007_v60 = vld [vmem:[#allocation5 + $0x2b0] sm:$0xff] }
 0x1ed   :  { %v417_v43 = vpop.f32.mrf.mxu1  ;;  %1648 = vmatprep.subr.mxu0 %v819_v61 }
 0x1ee   :  { %v418_v44 = vadd.f32 %v1205_v62, %v417_v43  ;;  %1564 = vmatprep.mubr.f32.mxu0 %v438_v40  ;;  %v441_v46 = vmax.f32 %v423_v42, 0.0  ;;  %v818_v62 = vld [vmem:[#allocation5 + $0x218] sm:$0xff]  ;;  %1649 = vmatpush3.msra.mxu0 %v819_v61  ;;  %v1006_v61 = vld [vmem:[#allocation5 + $0x2a8] sm:$0xff] }
 0x1ef   :  { %1565 = vmatmul.mubr.f32.gmra.mxu0 %v439_v41  ;;  %1650 = vmatprep.subr.mxu0 %v818_v62 }
 0x1f0   :  { %v440_v45 = vmax.f32 %v418_v44, 0.0  ;;  %1651 = vmatpush3.msra.mxu0 %v818_v62  ;;  %v1005_v62 = vld [vmem:[#allocation5 + $0x2a0] sm:$0xff] }
 0x1f1   :  { %1652 = vmatprep.subr.mxu0 %v817_v48 }
 0x1f2   :  { %1567 = vmatprep.mubr.f32.mxu0 %v440_v45  ;;  %1653 = vmatpush3.msra.mxu0 %v817_v48 }
 0x1f3   :  { %1568 = vmatmul.mubr.f32.gmra.mxu0 %v441_v46  ;;  %1654 = vmatprep.subr.mxu0 %v816_v49 }
 0x1f4   :  { %1655 = vmatpush3.msra.mxu0 %v816_v49  ;;  %v1003_v49 = vld [vmem:[#allocation5 + $0x290] sm:$0xff] }
 0x1f5   :  { %1656 = vmatprep.subr.mxu0 %v815_v50 }
 0x1f6   :  { %1657 = vmatpush3.msra.mxu0 %v815_v50  ;;  %v1002_v50 = vld [vmem:[#allocation5 + $0x288] sm:$0xff] }
 0x297   :  { %v1548_v0 = vpop.f32.mrf.mxu0 }
 0x298   :  { %v539_v1 = vadd.f32 %v1548_v0, %v1206_v63  ;;  %v1207_v0 = vld [vmem:[#allocation7 + $0x3] ss:$0 sm:$0xff] }
 0x299   :  { %v533_v2 = vpop.f32.mrf.mxu0 }
 0x29a   :  { %v534_v3 = vadd.f32 %v1206_v63, %v533_v2  ;;  %v613_v6 = vmax.f32 %v539_v1, 0.0 }
 0x29b   :  { %v1551_v4 = vpop.f32.mrf.mxu0 }
 0x29c   :  { %v612_v5 = vmax.f32 %v534_v3, 0.0  ;;  %v549_v7 = vadd.f32 %v1551_v4, %v1206_v63 }
 0x29d   :  { %v543_v8 = vpop.f32.mrf.mxu0 }
 0x29e   :  { %v544_v9 = vadd.f32 %v1206_v63, %v543_v8  ;;  %1602 = vmatprep.mubr.f32.mxu1 %v612_v5  ;;  %v615_v12 = vmax.f32 %v549_v7, 0.0 }
 0x29f   :  { %v1554_v10 = vpop.f32.mrf.mxu0  ;;  %1603 = vmatmul.mubr.f32.vlgmr.msra.gmra.mxu1 %v613_v6 }
 0x2a0   :  { %v614_v11 = vmax.f32 %v544_v9, 0.0  ;;  %v559_v13 = vadd.f32 %v1554_v10, %v1206_v63  ;;  %1683 = vmatpush3.msra.mxu1 %v1016_v51  ;;  %v1001_v51 = vld [vmem:[#allocation5 + $0x280] sm:$0xff] }
 0x2a1   :  { %v553_v14 = vpop.f32.mrf.mxu0  ;;  %1684 = vmatprep.subr.mxu1 %v1015_v52 }
 0x2a2   :  { %v554_v15 = vadd.f32 %v1206_v63, %v553_v14  ;;  %1605 = vmatprep.mubr.f32.mxu1 %v614_v11  ;;  %v617_v18 = vmax.f32 %v559_v13, 0.0  ;;  %1685 = vmatpush3.msra.mxu1 %v1015_v52  ;;  %v1208_v52 = vld [vmem:[#allocation7 + $0x4] ss:$0 sm:$0xff] }
 0x2a3   :  { %v1557_v16 = vpop.f32.mrf.mxu0  ;;  %1606 = vmatmul.mubr.f32.gmra.mxu1 %v615_v12  ;;  %1686 = vmatprep.subr.mxu1 %v1014_v53 }
 0x2a4   :  { %v616_v17 = vmax.f32 %v554_v15, 0.0  ;;  %v569_v19 = vadd.f32 %v1557_v16, %v1206_v63  ;;  %1687 = vmatpush3.msra.mxu1 %v1014_v53 }
 0x2a5   :  { %v563_v20 = vpop.f32.mrf.mxu0  ;;  %1688 = vmatprep.subr.mxu1 %v1013_v54 }
 0x2a6   :  { %v564_v21 = vadd.f32 %v1206_v63, %v563_v20  ;;  %1608 = vmatprep.mubr.f32.mxu1 %v616_v17  ;;  %v619_v24 = vmax.f32 %v569_v19, 0.0  ;;  %1689 = vmatpush3.msra.mxu1 %v1013_v54 }
 0x2a7   :  { %v1560_v22 = vpop.f32.mrf.mxu0  ;;  %1609 = vmatmul.mubr.f32.gmra.mxu1 %v617_v18  ;;  %1690 = vmatprep.subr.mxu1 %v1012_v55 }
 0x2a8   :  { %v618_v23 = vmax.f32 %v564_v21, 0.0  ;;  %v579_v25 = vadd.f32 %v1560_v22, %v1206_v63  ;;  %1691 = vmatpush3.msra.mxu1 %v1012_v55 }
 0x2a9   :  { %v573_v26 = vpop.f32.mrf.mxu0  ;;  %1692 = vmatprep.subr.mxu1 %v1011_v56 }
 0x2aa   :  { %v574_v27 = vadd.f32 %v1206_v63, %v573_v26  ;;  %1611 = vmatprep.mubr.f32.mxu1 %v618_v23  ;;  %v621_v30 = vmax.f32 %v579_v25, 0.0  ;;  %1693 = vmatpush3.msra.mxu1 %v1011_v56 }
 0x2ab   :  { %v1563_v28 = vpop.f32.mrf.mxu0  ;;  %1612 = vmatmul.mubr.f32.gmra.mxu1 %v619_v24  ;;  %1694 = vmatprep.subr.mxu1 %v1010_v57 }
 0x2ac   :  { %v620_v29 = vmax.f32 %v574_v27, 0.0  ;;  %v589_v31 = vadd.f32 %v1563_v28, %v1206_v63  ;;  %1695 = vmatpush3.msra.mxu1 %v1010_v57 }
 0x2ad   :  { %v583_v32 = vpop.f32.mrf.mxu0  ;;  %1696 = vmatprep.subr.mxu1 %v1009_v58 }
 0x2ae   :  { %v584_v33 = vadd.f32 %v1206_v63, %v583_v32  ;;  %1614 = vmatprep.mubr.f32.mxu1 %v620_v29  ;;  %v623_v36 = vmax.f32 %v589_v31, 0.0  ;;  %1697 = vmatpush3.msra.mxu1 %v1009_v58 }
 0x2af   :  { %v1566_v34 = vpop.f32.mrf.mxu0  ;;  %1615 = vmatmul.mubr.f32.gmra.mxu1 %v621_v30  ;;  %1698 = vmatprep.subr.mxu1 %v1008_v59 }
 0x2b0   :  { %v622_v35 = vmax.f32 %v584_v33, 0.0  ;;  %v599_v37 = vadd.f32 %v1566_v34, %v1206_v63  ;;  %1699 = vmatpush3.msra.mxu1 %v1008_v59 }
 0x2b1   :  { %v593_v38 = vpop.f32.mrf.mxu0  ;;  %1700 = vmatprep.subr.mxu1 %v1007_v60 }
 0x2b2   :  { %v594_v39 = vadd.f32 %v1206_v63, %v593_v38  ;;  %1617 = vmatprep.mubr.f32.mxu1 %v622_v35  ;;  %v625_v42 = vmax.f32 %v599_v37, 0.0  ;;  %1701 = vmatpush3.msra.mxu1 %v1007_v60 }
 0x2b3   :  { %v1569_v40 = vpop.f32.mrf.mxu0  ;;  %1618 = vmatmul.mubr.f32.gmra.mxu1 %v623_v36  ;;  %1702 = vmatprep.subr.mxu1 %v1006_v61 }
 0x2b4   :  { %v624_v41 = vmax.f32 %v594_v39, 0.0  ;;  %v609_v43 = vadd.f32 %v1569_v40, %v1206_v63  ;;  %1703 = vmatpush3.msra.mxu1 %v1006_v61 }
 0x2b5   :  { %v603_v44 = vpop.f32.mrf.mxu0  ;;  %1704 = vmatprep.subr.mxu1 %v1005_v62 }
 0x2b6   :  { %v604_v45 = vadd.f32 %v1206_v63, %v603_v44  ;;  %1620 = vmatprep.mubr.f32.mxu1 %v624_v41  ;;  %v627_v47 = vmax.f32 %v609_v43, 0.0  ;;  %v1004_v63 = vld [vmem:[#allocation5 + $0x298] sm:$0xff]  ;;  %1705 = vmatpush3.msra.mxu1 %v1005_v62 }
 0x2b7   :  { %1621 = vmatmul.mubr.f32.gmra.mxu1 %v625_v42  ;;  %1706 = vmatprep.subr.mxu1 %v1004_v63 }
 0x2b8   :  { %v626_v46 = vmax.f32 %v604_v45, 0.0  ;;  %1707 = vmatpush3.msra.mxu1 %v1004_v63 }
 0x2b9   :  { %1708 = vmatprep.subr.mxu1 %v1003_v49 }
 0x2ba   :  { %1623 = vmatprep.mubr.f32.mxu1 %v626_v46  ;;  %1709 = vmatpush3.msra.mxu1 %v1003_v49 }
 0x2bb   :  { %1624 = vmatmul.mubr.f32.gmra.mxu1 %v627_v47  ;;  %1710 = vmatprep.subr.mxu1 %v1002_v50 }
 0x2bc   :  { %1711 = vmatpush3.msra.mxu1 %v1002_v50 }
 0x2bd   :  { %1712 = vmatprep.subr.mxu1 %v1001_v51 }
 0x2be   :  { %1713 = vmatpush3.msra.mxu1 %v1001_v51 }
 0x35f   :  { %v1604_v1 = vpop.f32.mrf.mxu1 }
 0x360   :  { %v725_v2 = vadd.f32 %v1604_v1, %v1207_v0 }
 0x361   :  { %v719_v3 = vpop.f32.mrf.mxu1 }
 0x362   :  { %v720_v4 = vadd.f32 %v1207_v0, %v719_v3  ;;  %v799_v7 = vmax.f32 %v725_v2, 0.0 }
 0x363   :  { %v1607_v5 = vpop.f32.mrf.mxu1 }
 0x364   :  { %v798_v6 = vmax.f32 %v720_v4, 0.0  ;;  %v735_v8 = vadd.f32 %v1607_v5, %v1207_v0 }
 0x365   :  { %v729_v9 = vpop.f32.mrf.mxu1 }
 0x366   :  { %v730_v10 = vadd.f32 %v1207_v0, %v729_v9  ;;  %1658 = vmatprep.mubr.f32.mxu0 %v798_v6  ;;  %v801_v13 = vmax.f32 %v735_v8, 0.0 }
 0x367   :  { %v1610_v11 = vpop.f32.mrf.mxu1  ;;  %1659 = vmatmul.mubr.f32.vlgmr.msra.gmra.mxu0 %v799_v7 }
 0x368   :  { %v800_v12 = vmax.f32 %v730_v10, 0.0  ;;  %v745_v14 = vadd.f32 %v1610_v11, %v1207_v0 }
 0x369   :  { %v739_v15 = vpop.f32.mrf.mxu1 }
 0x36a   :  { %v740_v16 = vadd.f32 %v1207_v0, %v739_v15  ;;  %1661 = vmatprep.mubr.f32.mxu0 %v800_v12  ;;  %v803_v19 = vmax.f32 %v745_v14, 0.0 }
 0x36b   :  { %v1613_v17 = vpop.f32.mrf.mxu1  ;;  %1662 = vmatmul.mubr.f32.gmra.mxu0 %v801_v13 }
 0x36c   :  { %v802_v18 = vmax.f32 %v740_v16, 0.0  ;;  %v755_v20 = vadd.f32 %v1613_v17, %v1207_v0 }
 0x36d   :  { %v749_v21 = vpop.f32.mrf.mxu1 }
 0x36e   :  { %v750_v22 = vadd.f32 %v1207_v0, %v749_v21  ;;  %1664 = vmatprep.mubr.f32.mxu0 %v802_v18  ;;  %v805_v25 = vmax.f32 %v755_v20, 0.0 }
 0x36f   :  { %v1616_v23 = vpop.f32.mrf.mxu1  ;;  %1665 = vmatmul.mubr.f32.gmra.mxu0 %v803_v19 }
 0x370   :  { %v804_v24 = vmax.f32 %v750_v22, 0.0  ;;  %v765_v26 = vadd.f32 %v1616_v23, %v1207_v0 }
 0x371   :  { %v759_v27 = vpop.f32.mrf.mxu1 }
 0x372   :  { %v760_v28 = vadd.f32 %v1207_v0, %v759_v27  ;;  %1667 = vmatprep.mubr.f32.mxu0 %v804_v24  ;;  %v807_v31 = vmax.f32 %v765_v26, 0.0 }
 0x373   :  { %v1619_v29 = vpop.f32.mrf.mxu1  ;;  %1668 = vmatmul.mubr.f32.gmra.mxu0 %v805_v25 }
 0x374   :  { %v806_v30 = vmax.f32 %v760_v28, 0.0  ;;  %v775_v32 = vadd.f32 %v1619_v29, %v1207_v0 }
 0x375   :  { %v769_v33 = vpop.f32.mrf.mxu1 }
 0x376   :  { %v770_v34 = vadd.f32 %v1207_v0, %v769_v33  ;;  %1670 = vmatprep.mubr.f32.mxu0 %v806_v30  ;;  %v809_v37 = vmax.f32 %v775_v32, 0.0 }
 0x377   :  { %v1622_v35 = vpop.f32.mrf.mxu1  ;;  %1671 = vmatmul.mubr.f32.gmra.mxu0 %v807_v31 }
 0x378   :  { %v808_v36 = vmax.f32 %v770_v34, 0.0  ;;  %v785_v38 = vadd.f32 %v1622_v35, %v1207_v0 }
 0x379   :  { %v779_v39 = vpop.f32.mrf.mxu1 }
 0x37a   :  { %v780_v40 = vadd.f32 %v1207_v0, %v779_v39  ;;  %1673 = vmatprep.mubr.f32.mxu0 %v808_v36  ;;  %v811_v43 = vmax.f32 %v785_v38, 0.0 }
 0x37b   :  { %v1625_v41 = vpop.f32.mrf.mxu1  ;;  %1674 = vmatmul.mubr.f32.gmra.mxu0 %v809_v37  ;;  %v1209_v37 = vld [vmem:[#allocation7 + $0x5] ss:$0 sm:$0xff] }
 0x37c   :  { %v810_v42 = vmax.f32 %v780_v40, 0.0  ;;  %v795_v44 = vadd.f32 %v1625_v41, %v1207_v0 }
 0x37d   :  { %v789_v45 = vpop.f32.mrf.mxu1 }
 0x37e   :  { %v790_v46 = vadd.f32 %v1207_v0, %v789_v45  ;;  %1676 = vmatprep.mubr.f32.mxu0 %v810_v42  ;;  %v813_v48 = vmax.f32 %v795_v44, 0.0 }
 0x37f   :  { %1677 = vmatmul.mubr.f32.gmra.mxu0 %v811_v43 }
 0x380   :  { %v812_v47 = vmax.f32 %v790_v46, 0.0 }
 0x382   :  { %1679 = vmatprep.mubr.f32.mxu0 %v812_v47 }
 0x383   :  { %1680 = vmatmul.mubr.f32.gmra.mxu0 %v813_v48 }
 0x427   :  { %v1660_v53 = vpop.f32.mrf.mxu0 }
 0x428   :  { %v911_v54 = vadd.f32 %v1660_v53, %v1208_v52 }
 0x429   :  { %v905_v55 = vpop.f32.mrf.mxu0 }
 0x42a   :  { %v906_v56 = vadd.f32 %v1208_v52, %v905_v55  ;;  %v985_v59 = vmax.f32 %v911_v54, 0.0 }
 0x42b   :  { %v1663_v57 = vpop.f32.mrf.mxu0 }
 0x42c   :  { %v984_v58 = vmax.f32 %v906_v56, 0.0  ;;  %v921_v60 = vadd.f32 %v1663_v57, %v1208_v52 }
 0x42d   :  { %v915_v61 = vpop.f32.mrf.mxu0 }
 0x42e   :  { %v916_v62 = vadd.f32 %v1208_v52, %v915_v61  ;;  %1714 = vmatprep.mubr.f32.mxu1 %v984_v58  ;;  %v987_v1 = vmax.f32 %v921_v60, 0.0 }
 0x42f   :  { %v1666_v63 = vpop.f32.mrf.mxu0  ;;  %1715 = vmatmul.mubr.f32.vlgmr.msra.gmra.mxu1 %v985_v59 }
 0x430   :  { %v986_v0 = vmax.f32 %v916_v62, 0.0  ;;  %v931_v2 = vadd.f32 %v1666_v63, %v1208_v52 }
 0x431   :  { %v925_v3 = vpop.f32.mrf.mxu0 }
 0x432   :  { %v926_v4 = vadd.f32 %v1208_v52, %v925_v3  ;;  %1717 = vmatprep.mubr.f32.mxu1 %v986_v0  ;;  %v989_v7 = vmax.f32 %v931_v2, 0.0 }
 0x433   :  { %v1669_v5 = vpop.f32.mrf.mxu0  ;;  %1718 = vmatmul.mubr.f32.gmra.mxu1 %v987_v1 }
 0x434   :  { %v988_v6 = vmax.f32 %v926_v4, 0.0  ;;  %v941_v8 = vadd.f32 %v1669_v5, %v1208_v52 }
 0x435   :  { %v935_v9 = vpop.f32.mrf.mxu0 }
 0x436   :  { %v936_v10 = vadd.f32 %v1208_v52, %v935_v9  ;;  %1720 = vmatprep.mubr.f32.mxu1 %v988_v6  ;;  %v991_v13 = vmax.f32 %v941_v8, 0.0 }
 0x437   :  { %v1672_v11 = vpop.f32.mrf.mxu0  ;;  %1721 = vmatmul.mubr.f32.gmra.mxu1 %v989_v7 }
 0x438   :  { %v990_v12 = vmax.f32 %v936_v10, 0.0  ;;  %v951_v14 = vadd.f32 %v1672_v11, %v1208_v52 }
 0x439   :  { %v945_v15 = vpop.f32.mrf.mxu0 }
 0x43a   :  { %v946_v16 = vadd.f32 %v1208_v52, %v945_v15  ;;  %1723 = vmatprep.mubr.f32.mxu1 %v990_v12  ;;  %v993_v19 = vmax.f32 %v951_v14, 0.0 }
 0x43b   :  { %v1675_v17 = vpop.f32.mrf.mxu0  ;;  %1724 = vmatmul.mubr.f32.gmra.mxu1 %v991_v13 }
 0x43c   :  { %v992_v18 = vmax.f32 %v946_v16, 0.0  ;;  %v961_v20 = vadd.f32 %v1675_v17, %v1208_v52 }
 0x43d   :  { %v955_v21 = vpop.f32.mrf.mxu0 }
 0x43e   :  { %v956_v22 = vadd.f32 %v1208_v52, %v955_v21  ;;  %1726 = vmatprep.mubr.f32.mxu1 %v992_v18  ;;  %v995_v25 = vmax.f32 %v961_v20, 0.0 }
 0x43f   :  { %v1678_v23 = vpop.f32.mrf.mxu0  ;;  %1727 = vmatmul.mubr.f32.gmra.mxu1 %v993_v19 }
 0x440   :  { %v994_v24 = vmax.f32 %v956_v22, 0.0  ;;  %v971_v26 = vadd.f32 %v1678_v23, %v1208_v52 }
 0x441   :  { %v965_v27 = vpop.f32.mrf.mxu0 }
 0x442   :  { %v966_v28 = vadd.f32 %v1208_v52, %v965_v27  ;;  %1729 = vmatprep.mubr.f32.mxu1 %v994_v24  ;;  %v997_v31 = vmax.f32 %v971_v26, 0.0 }
 0x443   :  { %v1681_v29 = vpop.f32.mrf.mxu0  ;;  %1730 = vmatmul.mubr.f32.gmra.mxu1 %v995_v25 }
 0x444   :  { %v996_v30 = vmax.f32 %v966_v28, 0.0  ;;  %v981_v32 = vadd.f32 %v1681_v29, %v1208_v52 }
 0x445   :  { %v975_v33 = vpop.f32.mrf.mxu0 }
 0x446   :  { %v976_v34 = vadd.f32 %v1208_v52, %v975_v33  ;;  %1732 = vmatprep.mubr.f32.mxu1 %v996_v30  ;;  %v999_v36 = vmax.f32 %v981_v32, 0.0 }
 0x447   :  { %1733 = vmatmul.mubr.f32.gmra.mxu1 %v997_v31 }
 0x448   :  { %v998_v35 = vmax.f32 %v976_v34, 0.0 }
 0x44a   :  { %1735 = vmatprep.mubr.f32.mxu1 %v998_v35 }
 0x44b   :  { %1736 = vmatmul.mubr.f32.gmra.mxu1 %v999_v36 }
 0x4ef   :  { %v1716_v38 = vpop.f32.mrf.mxu1 }
 0x4f0   :  { %v1097_v39 = vadd.f32 %v1716_v38, %v1209_v37 }
 0x4f1   :  { %v1091_v40 = vpop.f32.mrf.mxu1 }
 0x4f2   :  { %1171 = vst [vmem:[#allocation8 + $0x8] sm:$0xff] %v1097_v39  ;;  %v1092_v41 = vadd.f32 %v1209_v37, %v1091_v40 }
 0x4f3   :  { %v1719_v42 = vpop.f32.mrf.mxu1 }
 0x4f4   :  { %1170 = vst [vmem:[#allocation8] sm:$0xff] %v1092_v41  ;;  %v1107_v43 = vadd.f32 %v1719_v42, %v1209_v37 }
 0x4f5   :  { %v1101_v44 = vpop.f32.mrf.mxu1 }
 0x4f6   :  { %1173 = vst [vmem:[#allocation8 + $0x18] sm:$0xff] %v1107_v43  ;;  %v1102_v45 = vadd.f32 %v1209_v37, %v1101_v44 }
 0x4f7   :  { %v1722_v46 = vpop.f32.mrf.mxu1 }
 0x4f8   :  { %1172 = vst [vmem:[#allocation8 + $0x10] sm:$0xff] %v1102_v45  ;;  %v1117_v47 = vadd.f32 %v1722_v46, %v1209_v37 }
 0x4f9   :  { %v1111_v48 = vpop.f32.mrf.mxu1 }
 0x4fa   :  { %1175 = vst [vmem:[#allocation8 + $0x28] sm:$0xff] %v1117_v47  ;;  %v1112_v49 = vadd.f32 %v1209_v37, %v1111_v48 }
 0x4fb   :  { %v1725_v50 = vpop.f32.mrf.mxu1 }
 0x4fc   :  { %1174 = vst [vmem:[#allocation8 + $0x20] sm:$0xff] %v1112_v49  ;;  %v1127_v51 = vadd.f32 %v1725_v50, %v1209_v37 }
 0x4fd   :  { %v1121_v52 = vpop.f32.mrf.mxu1 }
 0x4fe   :  { %1177 = vst [vmem:[#allocation8 + $0x38] sm:$0xff] %v1127_v51  ;;  %v1122_v53 = vadd.f32 %v1209_v37, %v1121_v52 }
 0x4ff   :  { %v1728_v54 = vpop.f32.mrf.mxu1 }
 0x500   :  { %1176 = vst [vmem:[#allocation8 + $0x30] sm:$0xff] %v1122_v53  ;;  %v1137_v55 = vadd.f32 %v1728_v54, %v1209_v37 }
 0x501   :  { %v1131_v56 = vpop.f32.mrf.mxu1 }
 0x502   :  { %1179 = vst [vmem:[#allocation8 + $0x48] sm:$0xff] %v1137_v55  ;;  %v1132_v57 = vadd.f32 %v1209_v37, %v1131_v56 }
 0x503   :  { %v1731_v58 = vpop.f32.mrf.mxu1 }
 0x504   :  { %1178 = vst [vmem:[#allocation8 + $0x40] sm:$0xff] %v1132_v57  ;;  %v1147_v59 = vadd.f32 %v1731_v58, %v1209_v37 }
 0x505   :  { %v1141_v60 = vpop.f32.mrf.mxu1 }
 0x506   :  { %1181 = vst [vmem:[#allocation8 + $0x58] sm:$0xff] %v1147_v59  ;;  %v1142_v61 = vadd.f32 %v1209_v37, %v1141_v60 }
 0x507   :  { %v1734_v62 = vpop.f32.mrf.mxu1 }
 0x508   :  { %1180 = vst [vmem:[#allocation8 + $0x50] sm:$0xff] %v1142_v61  ;;  %v1157_v63 = vadd.f32 %v1734_v62, %v1209_v37 }
 0x509   :  { %v1151_v0 = vpop.f32.mrf.mxu1 }
 0x50a   :  { %1183 = vst [vmem:[#allocation8 + $0x68] sm:$0xff] %v1157_v63  ;;  %v1152_v1 = vadd.f32 %v1209_v37, %v1151_v0 }
 0x50b   :  { %v1737_v2 = vpop.f32.mrf.mxu1 }
 0x50c   :  { %1182 = vst [vmem:[#allocation8 + $0x60] sm:$0xff] %v1152_v1  ;;  %v1167_v3 = vadd.f32 %v1737_v2, %v1209_v37 }
 0x50d   :  { %v1161_v4 = vpop.f32.mrf.mxu1 }
 0x50e   :  { %1185 = vst [vmem:[#allocation8 + $0x78] sm:$0xff] %v1167_v3  ;;  %v1162_v5 = vadd.f32 %v1209_v37, %v1161_v4 }
 0x510   :  { %1184 = vst [vmem:[#allocation8 + $0x70] sm:$0xff] %v1162_v5 }
 0x511   :  { %1817 = shalt.err (!%p1814_p5)
}
 0x512   :  { %1197 = dma.vmem_to_hbm [thread:$0]  %s1192_s2, 2048, %s1884_s3, [#allocation4], %s1834_s17, %s1834_s17, %s1835_s18  }
 0x513   :  { %1830 = dma.done.wait [#allocation4], 2048  }
 0x514   :  { %1831 = vsyncadd [#allocation4], 4294965248 }
 0x515   :  { %1201 = vsyncpa [#allocation3], 1 }
 0x516   :  { %1202 = vsyncpa [#allocation6], 1 }
 0x517   :  { %1203 = vsyncpa [#allocation4], 1 }

</bundles_post_ra>
